<compile_context>
chip_gen: v7x
topology: tpu7x:2x2x1
jax: 0.10.0
libtpu: 0.0.40
codegen_flags: <defaults>
</compile_context>

<pallas_src>
import jax
import jax.numpy as jnp
from jax.experimental import pallas as pl
from jax.experimental.pallas import tpu as pltpu

_TARGET_BLOCK_BYTES = 1 * 1024 * 1024  # per main block


def _is_minor_aligned(a):
    return a.ndim >= 2 and (a.shape[-1] % 128 == 0) and (a.shape[-2] % 8 == 0)


def _shift_lane(a, off):
    """result[..., j] = a[..., j + off], zero-filled where j + off is out of range."""
    size = a.shape[-1]
    if abs(off) >= size:
        return jnp.zeros_like(a)
    if _is_minor_aligned(a):
        rolled = pltpu.roll(a, (-off) % size, a.ndim - 1)  # rolled[j] = a[(j+off)%size]
        idx = jax.lax.broadcasted_iota(jnp.int32, a.shape, a.ndim - 1)
        if off > 0:
            return jnp.where(idx >= size - off, 0.0, rolled)
        return jnp.where(idx < -off, 0.0, rolled)
    # Small / unaligned fallback: static slice + zero border.
    pad_shape = list(a.shape)
    pad_shape[-1] = abs(off)
    zeros = jnp.zeros(pad_shape, a.dtype)
    if off > 0:
        body = jax.lax.slice_in_dim(a, off, size, axis=a.ndim - 1)
        return jnp.concatenate([body, zeros], axis=a.ndim - 1)
    body = jax.lax.slice_in_dim(a, 0, size + off, axis=a.ndim - 1)
    return jnp.concatenate([zeros, body], axis=a.ndim - 1)


def _rot_rows(a, off, axis):
    """Cyclic: result[..., i, ...] = a[..., (i + off) % size, ...] along `axis`.

    Wrapped rows hold stale data, but the caller overwrites them with halo rows via
    `jnp.where`, so no zero-masking is required here (cheaper than a masked shift).
    """
    size = a.shape[axis]
    off = off % size
    if off == 0:
        return a
    if _is_minor_aligned(a) and axis >= a.ndim - 2:
        return pltpu.roll(a, (size - off) % size, axis)
    head = jax.lax.slice_in_dim(a, off, size, axis=axis)
    tail = jax.lax.slice_in_dim(a, 0, off, axis=axis)
    return jnp.concatenate([head, tail], axis=axis)


def _sobel_kernel(x_ref, top_ref, bot_ref, o_ref):
    # x_ref  : (B, TH, W) current row-tile of B images
    # top_ref: (B, 1, W)  row just above the tile (zeros at the top image border)
    # bot_ref: (B, 1, W)  row just below the tile (zeros at the bottom image border)
    x = x_ref[...].astype(jnp.float32)
    top = top_ref[...].astype(jnp.float32)
    bot = bot_ref[...].astype(jnp.float32)
    th = x.shape[1]

    def col_combos(a):
        left = _shift_lane(a, -1)    # a[:, :, j-1] (zero at j=0)
        right = _shift_lane(a, 1)    # a[:, :, j+1] (zero at j=W-1)
        return right - left, left + 2.0 * a + right   # (difference, smoothing)

    d, s = col_combos(x)
    d_t, s_t = col_combos(top)
    d_b, s_b = col_combos(bot)

    row = jax.lax.broadcasted_iota(jnp.int32, x.shape, 1)
    is_first = row == 0
    is_last = row == th - 1
    d_up = jnp.where(is_first, d_t, _rot_rows(d, -1, 1))   # D at row i-1
    d_dn = jnp.where(is_last, d_b, _rot_rows(d, 1, 1))     # D at row i+1
    s_up = jnp.where(is_first, s_t, _rot_rows(s, -1, 1))   # S at row i-1
    s_dn = jnp.where(is_last, s_b, _rot_rows(s, 1, 1))     # S at row i+1

    gx = d_up + 2.0 * d + d_dn      # kernelx = [[-1,0,1],[-2,0,2],[-1,0,1]]
    gy = s_up - s_dn                # kernely = [[1,2,1],[0,0,0],[-1,-2,-1]]
    o_ref[...] = (jnp.abs(gx) + jnp.abs(gy)).astype(o_ref.dtype)


def _row_tile(H, W, itemsize, target=_TARGET_BLOCK_BYTES):
    if H * W * itemsize <= target:
        return H
    aligned = [d for d in range(8, H, 8)
               if H % d == 0 and d * W * itemsize <= target]
    if aligned:
        return max(aligned)
    return H  # keep the block sublane-legal (full rows) if no aligned divisor fits


def _batch_block(N, th, W, itemsize, target=_TARGET_BLOCK_BYTES):
    fits = [b for b in range(1, N + 1) if N % b == 0 and b * th * W * itemsize <= target]
    return max(fits) if fits else 1


def sobelxy(x, *, tile_rows=None, batch_tile=None):
    """x: (N, 1, H, W) -> (N, 1, H, W), |sobel_x(x)| + |sobel_y(x)| with zero padding."""
    N, C, H, W = x.shape
    if C != 1:
        raise ValueError("Sobelxy uses single-channel 3x3 kernels (in_channels must be 1)")
    dtype = x.dtype
    itemsize = jnp.dtype(dtype).itemsize
    x2 = x.reshape(N, H, W)

    th = tile_rows if tile_rows is not None else _row_tile(H, W, itemsize)
    if H % th != 0:
        raise ValueError(f"tile_rows={th} must divide H={H}")
    nj = H // th
    b = batch_tile if batch_tile is not None else _batch_block(N, th, W, itemsize)
    if N % b != 0:
        raise ValueError(f"batch_tile={b} must divide N={N}")
    nb = N // b

    # 1-row halos above/below each row tile (zeros at the image border). Only
    # 2*(nj-1) rows per image of extra HBM traffic -- no full-image pad pass.
    if nj > 1:
        zrow = jnp.zeros((N, 1, W), dtype)
        top = jnp.concatenate([zrow, x2[:, th - 1:H - 1:th, :]], axis=1)  # (N, nj, W)
        bot = jnp.concatenate([x2[:, th::th, :], zrow], axis=1)           # (N, nj, W)
    else:
        top = jnp.zeros((N, 1, W), dtype)
        bot = jnp.zeros((N, 1, W), dtype)
    top = top.reshape(N, nj, 1, W)
    bot = bot.reshape(N, nj, 1, W)

    out = pl.pallas_call(
        _sobel_kernel,
        out_shape=jax.ShapeDtypeStruct((N, H, W), dtype),
        grid_spec=pltpu.PrefetchScalarGridSpec(
            num_scalar_prefetch=0,
            grid=(nb, nj),
            in_specs=[
                pl.BlockSpec((b, th, W), lambda n, j: (n, j, 0)),
                pl.BlockSpec((b, None, 1, W), lambda n, j: (n, j, 0, 0)),
                pl.BlockSpec((b, None, 1, W), lambda n, j: (n, j, 0, 0)),
            ],
            out_specs=pl.BlockSpec((b, th, W), lambda n, j: (n, j, 0)),
        ),
        compiler_params=pltpu.CompilerParams(
            dimension_semantics=("parallel", "parallel")),
    )(x2, top, bot)
    return out.reshape(N, 1, H, W)


def _reference(x):
    # Pure-JAX reference using lax conv (NCHW, OIHW), padding=1.
    kx = jnp.array([[-1., 0., 1.], [-2., 0., 2.], [-1., 0., 1.]],
                   dtype=jnp.float32).reshape(1, 1, 3, 3)
    ky = jnp.array([[1., 2., 1.], [0., 0., 0.], [-1., -2., -1.]],
                   dtype=jnp.float32).reshape(1, 1, 3, 3)
    xf = x.astype(jnp.float32)
    dn = jax.lax.conv_dimension_numbers(xf.shape, kx.shape, ("NCHW", "OIHW", "NCHW"))
    sx = jax.lax.conv_general_dilated(xf, kx, (1, 1), ((1, 1), (1, 1)),
                                      dimension_numbers=dn)
    sy = jax.lax.conv_general_dilated(xf, ky, (1, 1), ((1, 1), (1, 1)),
                                      dimension_numbers=dn)
    return (jnp.abs(sx) + jnp.abs(sy)).astype(x.dtype)


if __name__ == "__main__":
    k1, k2 = jax.random.split(jax.random.PRNGKey(0))

    # Small shape matching the module (C must be 1 for the (1,1,3,3) weights).
    x_small = jax.random.normal(k1, (2, 1, 16, 16), dtype=jnp.float32)
    out_small = jax.block_until_ready(sobelxy(x_small))
    assert out_small.shape == x_small.shape
    assert jnp.allclose(out_small, _reference(x_small), atol=1e-5, rtol=1e-5), \
        "small-shape mismatch vs reference conv"

    # Lane-aligned shape exercising row tiling with halos, multi-step parallel grid
    # and the pltpu.roll fast path (W % 128 == 0, TH % 8 == 0).
    x_wide = jax.random.normal(k2, (2, 1, 64, 256), dtype=jnp.float32)
    out_wide = jax.block_until_ready(sobelxy(x_wide, tile_rows=32, batch_tile=1))
    assert jnp.allclose(out_wide, _reference(x_wide), atol=1e-4, rtol=1e-5), \
        "tiled-shape mismatch vs reference conv"

    print("KERNEL_OK")
</pallas_src>

<mosaic_0001>
module attributes {stable_mosaic.version = 11 : i64} {
  func.func @_sobel_kernel(%arg0: i32, %arg1: i32, %arg2: memref<2x16x16xf32, #tpu.memory_space<vmem>>, %arg3: memref<2x1x1x16xf32, #tpu.memory_space<vmem>>, %arg4: memref<2x1x1x16xf32, #tpu.memory_space<vmem>>, %arg5: memref<2x16x16xf32, #tpu.memory_space<vmem>>) attributes {dimension_semantics = [#tpu.dimension_semantics<parallel>, #tpu.dimension_semantics<parallel>], iteration_bounds = array<i64: 1, 1>, scalar_prefetch = 0 : i64, scratch_operands = 0 : i64, tpu.core_type = #tpu.core_type<tc>, window_params = [{transform_indices = @transform_0, window_bounds = array<i64: 2, 16, 16>}, {transform_indices = @transform_1, window_bounds = array<i64: 2, 1, 1, 16>}, {transform_indices = @transform_2, window_bounds = array<i64: 2, 1, 1, 16>}, {transform_indices = @transform_3, window_bounds = array<i64: 2, 16, 16>}]} {
    %c0 = arith.constant 0 : index
    %c0_0 = arith.constant 0 : index
    %c0_1 = arith.constant 0 : index
    %0 = vector.load %arg2[%c0, %c0_0, %c0_1] : memref<2x16x16xf32, #tpu.memory_space<vmem>>, vector<2x16x16xf32>
    %c0_2 = arith.constant 0 : index
    %c0_3 = arith.constant 0 : index
    %c0_4 = arith.constant 0 : index
    %c0_5 = arith.constant 0 : index
    %1 = vector.load %arg3[%c0_2, %c0_3, %c0_4, %c0_5] : memref<2x1x1x16xf32, #tpu.memory_space<vmem>>, vector<2x1x1x16xf32>
    %2 = vector.shape_cast %1 : vector<2x1x1x16xf32> to vector<2x1x16xf32>
    %c0_6 = arith.constant 0 : index
    %c0_7 = arith.constant 0 : index
    %c0_8 = arith.constant 0 : index
    %c0_9 = arith.constant 0 : index
    %3 = vector.load %arg4[%c0_6, %c0_7, %c0_8, %c0_9] : memref<2x1x1x16xf32, #tpu.memory_space<vmem>>, vector<2x1x1x16xf32>
    %4 = vector.shape_cast %3 : vector<2x1x1x16xf32> to vector<2x1x16xf32>
    %cst = arith.constant 0.000000e+00 : f32
    %5 = vector.broadcast %cst : f32 to vector<2x16x1xf32>
    %6 = vector.extract_strided_slice %0 {offsets = [0, 0, 0], sizes = [2, 16, 15], strides = [1, 1, 1]} : vector<2x16x16xf32> to vector<2x16x15xf32>
    %7 = tpu.concatenate %5, %6 in 2 : vector<2x16x1xf32>, vector<2x16x15xf32> -> vector<2x16x16xf32>
    %cst_10 = arith.constant 0.000000e+00 : f32
    %8 = vector.broadcast %cst_10 : f32 to vector<2x16x1xf32>
    %9 = vector.extract_strided_slice %0 {offsets = [0, 0, 1], sizes = [2, 16, 15], strides = [1, 1, 1]} : vector<2x16x16xf32> to vector<2x16x15xf32>
    %10 = tpu.concatenate %9, %8 in 2 : vector<2x16x15xf32>, vector<2x16x1xf32> -> vector<2x16x16xf32>
    %11 = arith.subf %10, %7 : vector<2x16x16xf32>
    %cst_11 = arith.constant 2.000000e+00 : f32
    %12 = vector.broadcast %cst_11 : f32 to vector<2x16x16xf32>
    %13 = arith.mulf %12, %0 : vector<2x16x16xf32>
    %14 = arith.addf %7, %13 : vector<2x16x16xf32>
    %15 = arith.addf %14, %10 : vector<2x16x16xf32>
    %cst_12 = arith.constant 0.000000e+00 : f32
    %16 = vector.broadcast %cst_12 : f32 to vector<2x1x1xf32>
    %17 = vector.extract_strided_slice %2 {offsets = [0, 0, 0], sizes = [2, 1, 15], strides = [1, 1, 1]} : vector<2x1x16xf32> to vector<2x1x15xf32>
    %18 = tpu.concatenate %16, %17 in 2 : vector<2x1x1xf32>, vector<2x1x15xf32> -> vector<2x1x16xf32>
    %cst_13 = arith.constant 0.000000e+00 : f32
    %19 = vector.broadcast %cst_13 : f32 to vector<2x1x1xf32>
    %20 = vector.extract_strided_slice %2 {offsets = [0, 0, 1], sizes = [2, 1, 15], strides = [1, 1, 1]} : vector<2x1x16xf32> to vector<2x1x15xf32>
    %21 = tpu.concatenate %20, %19 in 2 : vector<2x1x15xf32>, vector<2x1x1xf32> -> vector<2x1x16xf32>
    %22 = arith.subf %21, %18 : vector<2x1x16xf32>
    %cst_14 = arith.constant 2.000000e+00 : f32
    %23 = vector.broadcast %cst_14 : f32 to vector<2x1x16xf32>
    %24 = arith.mulf %23, %2 : vector<2x1x16xf32>
    %25 = arith.addf %18, %24 : vector<2x1x16xf32>
    %26 = arith.addf %25, %21 : vector<2x1x16xf32>
    %cst_15 = arith.constant 0.000000e+00 : f32
    %27 = vector.broadcast %cst_15 : f32 to vector<2x1x1xf32>
    %28 = vector.extract_strided_slice %4 {offsets = [0, 0, 0], sizes = [2, 1, 15], strides = [1, 1, 1]} : vector<2x1x16xf32> to vector<2x1x15xf32>
    %29 = tpu.concatenate %27, %28 in 2 : vector<2x1x1xf32>, vector<2x1x15xf32> -> vector<2x1x16xf32>
    %cst_16 = arith.constant 0.000000e+00 : f32
    %30 = vector.broadcast %cst_16 : f32 to vector<2x1x1xf32>
    %31 = vector.extract_strided_slice %4 {offsets = [0, 0, 1], sizes = [2, 1, 15], strides = [1, 1, 1]} : vector<2x1x16xf32> to vector<2x1x15xf32>
    %32 = tpu.concatenate %31, %30 in 2 : vector<2x1x15xf32>, vector<2x1x1xf32> -> vector<2x1x16xf32>
    %33 = arith.subf %32, %29 : vector<2x1x16xf32>
    %cst_17 = arith.constant 2.000000e+00 : f32
    %34 = vector.broadcast %cst_17 : f32 to vector<2x1x16xf32>
    %35 = arith.mulf %34, %4 : vector<2x1x16xf32>
    %36 = arith.addf %29, %35 : vector<2x1x16xf32>
    %37 = arith.addf %36, %32 : vector<2x1x16xf32>
    %38 = tpu.iota {dimensions = array<i32: 1>} : vector<2x16x16xi32>
    %c0_i32 = arith.constant 0 : i32
    %39 = vector.broadcast %c0_i32 : i32 to vector<2x16x16xi32>
    %40 = arith.cmpi eq, %38, %39 : vector<2x16x16xi32>
    %c15_i32 = arith.constant 15 : i32
    %41 = vector.broadcast %c15_i32 : i32 to vector<2x16x16xi32>
    %42 = arith.cmpi eq, %38, %41 : vector<2x16x16xi32>
    %43 = vector.extract_strided_slice %11 {offsets = [0, 15, 0], sizes = [2, 1, 16], strides = [1, 1, 1]} : vector<2x16x16xf32> to vector<2x1x16xf32>
    %44 = vector.extract_strided_slice %11 {offsets = [0, 0, 0], sizes = [2, 15, 16], strides = [1, 1, 1]} : vector<2x16x16xf32> to vector<2x15x16xf32>
    %45 = tpu.concatenate %43, %44 in 1 : vector<2x1x16xf32>, vector<2x15x16xf32> -> vector<2x16x16xf32>
    %46 = vector.shape_cast %22 : vector<2x1x16xf32> to vector<2x1x16xf32>
    %47 = vector.broadcast %46 : vector<2x1x16xf32> to vector<2x16x16xf32>
    %48 = arith.select %40, %47, %45 : vector<2x16x16xi1>, vector<2x16x16xf32>
    %49 = vector.extract_strided_slice %11 {offsets = [0, 1, 0], sizes = [2, 15, 16], strides = [1, 1, 1]} : vector<2x16x16xf32> to vector<2x15x16xf32>
    %50 = vector.extract_strided_slice %11 {offsets = [0, 0, 0], sizes = [2, 1, 16], strides = [1, 1, 1]} : vector<2x16x16xf32> to vector<2x1x16xf32>
    %51 = tpu.concatenate %49, %50 in 1 : vector<2x15x16xf32>, vector<2x1x16xf32> -> vector<2x16x16xf32>
    %52 = vector.shape_cast %33 : vector<2x1x16xf32> to vector<2x1x16xf32>
    %53 = vector.broadcast %52 : vector<2x1x16xf32> to vector<2x16x16xf32>
    %54 = arith.select %42, %53, %51 : vector<2x16x16xi1>, vector<2x16x16xf32>
    %55 = vector.extract_strided_slice %15 {offsets = [0, 15, 0], sizes = [2, 1, 16], strides = [1, 1, 1]} : vector<2x16x16xf32> to vector<2x1x16xf32>
    %56 = vector.extract_strided_slice %15 {offsets = [0, 0, 0], sizes = [2, 15, 16], strides = [1, 1, 1]} : vector<2x16x16xf32> to vector<2x15x16xf32>
    %57 = tpu.concatenate %55, %56 in 1 : vector<2x1x16xf32>, vector<2x15x16xf32> -> vector<2x16x16xf32>
    %58 = vector.shape_cast %26 : vector<2x1x16xf32> to vector<2x1x16xf32>
    %59 = vector.broadcast %58 : vector<2x1x16xf32> to vector<2x16x16xf32>
    %60 = arith.select %40, %59, %57 : vector<2x16x16xi1>, vector<2x16x16xf32>
    %61 = vector.extract_strided_slice %15 {offsets = [0, 1, 0], sizes = [2, 15, 16], strides = [1, 1, 1]} : vector<2x16x16xf32> to vector<2x15x16xf32>
    %62 = vector.extract_strided_slice %15 {offsets = [0, 0, 0], sizes = [2, 1, 16], strides = [1, 1, 1]} : vector<2x16x16xf32> to vector<2x1x16xf32>
    %63 = tpu.concatenate %61, %62 in 1 : vector<2x15x16xf32>, vector<2x1x16xf32> -> vector<2x16x16xf32>
    %64 = vector.shape_cast %37 : vector<2x1x16xf32> to vector<2x1x16xf32>
    %65 = vector.broadcast %64 : vector<2x1x16xf32> to vector<2x16x16xf32>
    %66 = arith.select %42, %65, %63 : vector<2x16x16xi1>, vector<2x16x16xf32>
    %cst_18 = arith.constant 2.000000e+00 : f32
    %67 = vector.broadcast %cst_18 : f32 to vector<2x16x16xf32>
    %68 = arith.mulf %67, %11 : vector<2x16x16xf32>
    %69 = arith.addf %48, %68 : vector<2x16x16xf32>
    %70 = arith.addf %69, %54 : vector<2x16x16xf32>
    %71 = arith.subf %60, %66 : vector<2x16x16xf32>
    %72 = math.absf %70 : vector<2x16x16xf32>
    %73 = math.absf %71 : vector<2x16x16xf32>
    %74 = arith.addf %72, %73 : vector<2x16x16xf32>
    %c0_19 = arith.constant 0 : index
    %c0_20 = arith.constant 0 : index
    %c0_21 = arith.constant 0 : index
    %75 = vector.load %arg5[%c0_19, %c0_20, %c0_21] : memref<2x16x16xf32, #tpu.memory_space<vmem>>, vector<2x16x16xf32>
    tpu.vector_store %arg5[%c0_19, %c0_20, %c0_21], %74 {strides = array<i32>} : memref<2x16x16xf32, #tpu.memory_space<vmem>>, vector<2x16x16xf32>,
    return
  }
  func.func @transform_0(%arg0: i32, %arg1: i32) -> (i32, i32, i32) {
    %c0_i32 = arith.constant 0 : i32
    %c0_i32_0 = arith.constant 0 : i32
    return %arg0, %arg1, %c0_i32 : i32, i32, i32
  }
  func.func @transform_1(%arg0: i32, %arg1: i32) -> (i32, i32, i32, i32) {
    %c0_i32 = arith.constant 0 : i32
    %c0_i32_0 = arith.constant 0 : i32
    %c0_i32_1 = arith.constant 0 : i32
    return %arg0, %arg1, %c0_i32, %c0_i32_0 : i32, i32, i32, i32
  }
  func.func @transform_2(%arg0: i32, %arg1: i32) -> (i32, i32, i32, i32) {
    %c0_i32 = arith.constant 0 : i32
    %c0_i32_0 = arith.constant 0 : i32
    %c0_i32_1 = arith.constant 0 : i32
    return %arg0, %arg1, %c0_i32, %c0_i32_0 : i32, i32, i32, i32
  }
  func.func @transform_3(%arg0: i32, %arg1: i32) -> (i32, i32, i32) {
    %c0_i32 = arith.constant 0 : i32
    %c0_i32_0 = arith.constant 0 : i32
    return %arg0, %arg1, %c0_i32 : i32, i32, i32
  }
}

</mosaic_0001>

<bundles_post_ra>
// kernel: tpu_custom_call.1
= control target key start
LH: loop header
LB: loop body
LE: loop exit
PB: predicated region body
PF: predicated region fallthrough
CT: control target
= control target key end

     0   :  { %8 = vsyncpa [#allocation3], 0  ;;  %s568_s0 = inlined_call_operand.hbm [shape: f32[2,16,16], index: 0, kind: input, shape index: {}]   ;;  %s569_s1 = inlined_call_operand.vmem [shape: f32[2,1,1,16], index: 1, kind: input, shape index: {}]   ;;  %s570_s2 = inlined_call_operand.vmem [shape: f32[2,1,1,16], index: 2, kind: input, shape index: {}]   ;;  %s571_s3 = inlined_call_operand.hbm [shape: f32[2,16,16], index: 3, kind: output, shape index: {}]  }
   0x1   :  { %9 = vsyncpa [#allocation4], 0  ;;  %s384_s12 = smov [#allocation2]   ;;  %s336_s16 = scalar_lea.hbm %s568_s0, 512 }
   0x2   :  { %s15_s13 = sshll.u32 %s384_s12, 4  ;;  %p337_p0 = scmp.ne.s32.totalorder %s568_s0, %s336_s16  ;;  %s16_s13 = int_to_ptr.vmem [resolvable:$true] %s15_s13 }
   0x3   :  { %p340_p1 = scmp.lt.u32.totalorder %s336_s16, %s568_s0 }
   0x5   :  { %p342_p2 = pnand %p340_p1, %p337_p0 }
   0x7   :  { %345 = shalt.err (!%p342_p2)
}
   0x8   :  { %s346_s21 = scalar_lea.vmem %s16_s13, 512  ;;  %p351_p4 = scmp.lt.s32.totalorder %s16_s13, %s16_s13 }
   0x9   :  { %p347_p3 = scmp.ne.s32.totalorder %s16_s13, %s346_s21  ;;  %p352_p5 = scmp.lt.s32.totalorder %s346_s21, %s346_s21 }
   0xb   :  { %p353_p6 = por %p352_p5, %p351_p4 }
   0xd   :  { %p354_p7 = pnand %p353_p6, %p347_p3 }
   0xf   :  { %357 = shalt.err (!%p354_p7)
}
  0x10   :  { %s385_s22 = smov 128   ;;  %s386_s23 = smov 8  }
  0x11   :  { %21 = dma.hbm_to_vmem [thread:$0]  %s568_s0, 512, %s16_s13, [#allocation3], %s385_s22, %s385_s22, %s386_s23  }
  0x12   :  { %380 = dma.done.wait [#allocation3], 512  }
  0x13   :  { %381 = vsyncadd [#allocation3], 4294966784  ;;  %v31_v0 = vld [vmem:[#allocation2 + $0x10] sm:$0xff]  ;;  %v29_v1 = vld [vmem:[#allocation2] sm:$0xff]  ;;  %s387_s26 = smov 1   ;;  %v93_v2 = vlaneseq  ;;  %s388_s27 = smov 127  }
  0x14   :  { %45 = vrot.lane.b32.xlu1 %v31_v0, %s387_s26  ;;  %41 = vrot.lane.b32.xlu0 %v29_v1, %s387_s26  ;;  %v32_v3 = vld [vmem:[#allocation2 + $0x18] sm:$0xff]  ;;  %v30_v4 = vld [vmem:[#allocation2 + $0x8] sm:$0xff]  ;;  %v34_v7 = vld [vmem:[%s569_s1 + $0x1] sm:$0x1]  ;;  %vm53_vm0 = vcmask 7168   ;;  %v79_v17 = vmul.f32 2.0, %v29_v1 }
  0x15   :  { %v425_v5 = vshrl.u32 %v93_v2, 7  ;;  %v33_v8 = vld [vmem:[%s569_s1] sm:$0x1]  ;;  %v36_v11 = vld [vmem:[%s570_s2 + $0x1] sm:$0x1]  ;;  %v80_v19 = vmul.f32 2.0, %v30_v4 }
  0x16   :  { %v35_v12 = vld [vmem:[%s570_s2] sm:$0x1]  ;;  %vm70_vm1 = vcmask 121856   ;;  %vm174_vm2 = vcmask 1040384   ;;  %vm197_vm3 = vcmask 1046528   ;;  %v81_v23 = vmul.f32 2.0, %v31_v0 }
  0x17   :  { %v428_v6 = vsub.s32 0, %v425_v5  ;;  %v82_v25 = vmul.f32 2.0, %v32_v3  ;;  %v120_v32 = vmul.f32 2.0, %v34_v7  ;;  %v119_v37 = vmul.f32 2.0, %v33_v8  ;;  %s389_s1 = smov [#allocation5]  }
  0x18   :  { %47 = vrot.lane.b32.xlu1 %v32_v3, %s387_s26  ;;  %43 = vrot.lane.b32.xlu0 %v30_v4, %s387_s26  ;;  %v455_v38 = vmul.f32 2.0, %v36_v11  ;;  %v457_v39 = vmul.f32 2.0, %v35_v12  ;;  %v460_v40 = vadd.s32 8, %v425_v5  ;;  %vm162_vm4 = vcmp.eq.s32.totalorder %v425_v5, 0  ;;  %s318_s2 = sshll.u32 %s389_s1, 4  ;;  %s319_s2 = int_to_ptr.vmem [resolvable:$true] %s318_s2 }
  0x19   :  { %v100_v9 = vrot.slane %v34_v7, %v428_v6  ;;  %v96_v10 = vrot.slane %v33_v8, %v428_v6  ;;  %v134_v13 = vrot.slane %v36_v11, %v428_v6  ;;  %v130_v14 = vrot.slane %v35_v12, %v428_v6  ;;  %s358_s8 = scalar_lea.vmem %s319_s2, 512  ;;  %p363_p9 = scmp.lt.s32.totalorder %s319_s2, %s319_s2 }
  0x1a   :  { %vm165_vm5 = vcmp.eq.s32.totalorder %v460_v40, 15  ;;  %vm308_vm6 = vcmask 130048   ;;  %p359_p8 = scmp.ne.s32.totalorder %s319_s2, %s358_s8  ;;  %p364_p10 = scmp.lt.s32.totalorder %s358_s8, %s358_s8 }
  0x1c   :  { %60 = vrot.lane.b32.xlu1 %v30_v4, %s388_s27  ;;  %58 = vrot.lane.b32.xlu0 %v29_v1, %s388_s27  ;;  %p365_p11 = por %p364_p10, %p363_p9 }
  0x1e   :  { %p366_p12 = pnand %p365_p11, %p359_p8 }
  0x20   :  { %64 = vrot.lane.b32.xlu1 %v32_v3, %s388_s27  ;;  %62 = vrot.lane.b32.xlu0 %v31_v0, %s388_s27 }
  0x24   :  { %103 = vrot.lane.b32.xlu1 %v100_v9, %s387_s26  ;;  %101 = vrot.lane.b32.xlu0 %v96_v10, %s387_s26 }
  0x28   :  { %111 = vrot.lane.b32.xlu1 %v100_v9, %s388_s27  ;;  %109 = vrot.lane.b32.xlu0 %v96_v10, %s388_s27 }
  0x2c   :  { %137 = vrot.lane.b32.xlu1 %v134_v13, %s387_s26  ;;  %135 = vrot.lane.b32.xlu0 %v130_v14, %s387_s26 }
  0x30   :  { %145 = vrot.lane.b32.xlu1 %v134_v13, %s388_s27  ;;  %143 = vrot.lane.b32.xlu0 %v130_v14, %s388_s27 }
  0x86   :  { %v46_v15 = vpop.permute.xlu1 %45  ;;  %v42_v16 = vpop.permute.xlu0 %41 }
  0x87   :  { %v54_v21 = vsel %vm53_vm0, 0.0, %v42_v16  ;;  %v56_v41 = vsel %vm53_vm0, 0.0, %v46_v15 }
  0x88   :  { %v83_v24 = vadd.f32 %v79_v17, %v54_v21  ;;  %v85_v55 = vadd.f32 %v81_v23, %v56_v41 }
  0x8a   :  { %v48_v18 = vpop.permute.xlu1 %47  ;;  %v44_v20 = vpop.permute.xlu0 %43 }
  0x8b   :  { %v55_v22 = vsel %vm53_vm0, 0.0, %v44_v20  ;;  %v57_v29 = vsel %vm53_vm0, 0.0, %v48_v18 }
  0x8c   :  { %v84_v26 = vadd.f32 %v80_v19, %v55_v22  ;;  %v86_v42 = vadd.f32 %v82_v25, %v57_v29 }
  0x8e   :  { %v61_v27 = vpop.permute.xlu1 %60  ;;  %v59_v28 = vpop.permute.xlu0 %58 }
  0x8f   :  { %v72_v30 = vsel %vm70_vm1, %v61_v27, 0.0  ;;  %v71_v31 = vsel %vm70_vm1, %v59_v28, 0.0 }
  0x90   :  { %v451_v33 = vsub.f32 %v72_v30, %v55_v22  ;;  %v88_v34 = vadd.f32 %v84_v26, %v72_v30  ;;  %v453_v35 = vsub.f32 %v71_v31, %v54_v21  ;;  %v87_v36 = vadd.f32 %v83_v24, %v71_v31 }
  0x92   :  { %v226_v43 = vrot.slane %v88_v34, 7  ;;  %v255_v44 = vrot.slane %v88_v34, 1  ;;  %v65_v45 = vpop.permute.xlu1 %64  ;;  %v63_v46 = vpop.permute.xlu0 %62  ;;  %v168_v47 = vrot.slane %v451_v33, 7  ;;  %v199_v48 = vrot.slane %v451_v33, 1 }
  0x93   :  { %v175_v49 = vrot.slane %v453_v35, 7  ;;  %v232_v50 = vrot.slane %v87_v36, 7  ;;  %v198_v51 = vrot.slane %v453_v35, 1  ;;  %v254_v52 = vrot.slane %v87_v36, 1 }
  0x94   :  { %v74_v53 = vsel %vm70_vm1, %v65_v45, 0.0  ;;  %v73_v54 = vsel %vm70_vm1, %v63_v46, 0.0  ;;  %v470_v56 = vmul.f32 2.0, %v451_v33  ;;  %v280_v2 = vmul.f32 2.0, %v453_v35 }
  0x95   :  { %v473_v57 = vsel %vm174_vm2, %v232_v50, %v226_v43  ;;  %v240_v58 = vsel %vm174_vm2, %v226_v43, %v232_v50  ;;  %v477_v59 = vsel %vm197_vm3, %v254_v52, %v255_v44  ;;  %v480_v60 = vsel %vm197_vm3, %v255_v44, %v254_v52 }
  0x96   :  { %v78_v61 = vsub.f32 %v74_v53, %v57_v29  ;;  %v90_v62 = vadd.f32 %v86_v42, %v74_v53  ;;  %v104_v63 = vpop.permute.xlu1 %103  ;;  %v102_v0 = vpop.permute.xlu0 %101  ;;  %v484_v1 = vsel %vm174_vm2, %v175_v49, %v168_v47  ;;  %v77_v3 = vsub.f32 %v73_v54, %v56_v41 }
  0x97   :  { %v89_v4 = vadd.f32 %v85_v55, %v73_v54  ;;  %v200_v7 = vsel %vm197_vm3, %v198_v51, %v199_v48  ;;  %v108_v10 = vsel %vm53_vm0, 0.0, %v104_v63  ;;  %v107_v14 = vsel %vm53_vm0, 0.0, %v102_v0 }
  0x98   :  { %v227_v8 = vrot.slane %v90_v62, 7  ;;  %v258_v9 = vrot.slane %v90_v62, 1  ;;  %v169_v11 = vrot.slane %v78_v61, 7  ;;  %v177_v12 = vrot.slane %v77_v3, 7 }
  0x99   :  { %v234_v13 = vrot.slane %v89_v4, 7  ;;  %v202_v15 = vrot.slane %v78_v61, 1  ;;  %v283_v16 = vmul.f32 2.0, %v78_v61  ;;  %v201_v17 = vrot.slane %v77_v3, 1 }
  0x9a   :  { %v257_v18 = vrot.slane %v89_v4, 1  ;;  %v112_v19 = vpop.permute.xlu1 %111  ;;  %v110_v20 = vpop.permute.xlu0 %109  ;;  %v282_v23 = vmul.f32 2.0, %v77_v3  ;;  %v122_v24 = vadd.f32 %v120_v32, %v108_v10  ;;  %v121_v27 = vadd.f32 %v119_v37, %v107_v14 }
  0x9b   :  { %v495_v21 = vsel %vm174_vm2, %v234_v13, %v227_v8  ;;  %v241_v22 = vsel %vm174_vm2, %v227_v8, %v234_v13  ;;  %v116_v28 = vsel %vm70_vm1, %v112_v19, 0.0  ;;  %v178_v29 = vsel %vm174_vm2, %v177_v12, %v169_v11 }
  0x9c   :  { %v259_v25 = vsel %vm197_vm3, %v257_v18, %v258_v9  ;;  %v267_v26 = vsel %vm197_vm3, %v258_v9, %v257_v18  ;;  %v118_v30 = vsub.f32 %v116_v28, %v108_v10  ;;  %v124_v31 = vadd.f32 %v122_v24, %v116_v28 }
  0x9d   :  { %v115_v34 = vsel %vm70_vm1, %v110_v20, 0.0  ;;  %v203_v36 = vsel %vm197_vm3, %v201_v17, %v202_v15  ;;  %v184_v41 = vsel %vm174_vm2, %v169_v11, %v177_v12  ;;  %v183_v52 = vsel %vm174_vm2, %v168_v47, %v175_v49 }
  0x9e   :  { %v117_v32 = vsub.f32 %v115_v34, %v107_v14  ;;  %v123_v42 = vadd.f32 %v121_v27, %v115_v34  ;;  %v138_v43 = vpop.permute.xlu1 %137  ;;  %v136_v44 = vpop.permute.xlu0 %135  ;;  %v192_v37 = vrot.slane %v118_v30, %v428_v6  ;;  %v249_v45 = vrot.slane %v124_v31, %v428_v6 }
  0x9f   :  { %v142_v46 = vsel %vm53_vm0, 0.0, %v138_v43  ;;  %v141_v50 = vsel %vm53_vm0, 0.0, %v136_v44  ;;  %v211_v55 = vsel %vm197_vm3, %v202_v15, %v201_v17  ;;  %v287_v15 = vadd.f32 %v283_v16, %v178_v29 }
  0xa0   :  { %v188_v53 = vrot.slane %v117_v32, %v428_v6  ;;  %v245_v54 = vrot.slane %v123_v42, %v428_v6  ;;  %v195_v61 = vsel %vm162_vm4, %v192_v37, %v184_v41  ;;  %v252_v62 = vsel %vm162_vm4, %v249_v45, %v241_v22 }
  0xa1   :  { %v156_v63 = vadd.f32 %v455_v38, %v142_v46  ;;  %v155_v0 = vadd.f32 %v457_v39, %v141_v50  ;;  %v286_v3 = vadd.f32 %v282_v23, %v195_v61  ;;  %v294_v4 = vsub.f32 %v252_v62, %v259_v25 }
  0xa2   :  { %v193_v47 = vsel %vm162_vm4, %v188_v53, %v183_v52  ;;  %v250_v49 = vsel %vm162_vm4, %v245_v54, %v240_v58  ;;  %v146_v8 = vpop.permute.xlu1 %145  ;;  %v144_v9 = vpop.permute.xlu0 %143  ;;  %v210_v5 = vsel %vm197_vm3, %v199_v48, %v198_v51  ;;  %v285_v48 = vadd.f32 %v470_v56, %v484_v1 }
  0xa3   :  { %v284_v10 = vadd.f32 %v280_v2, %v193_v47  ;;  %v292_v11 = vsub.f32 %v250_v49, %v477_v59  ;;  %v150_v12 = vsel %vm70_vm1, %v146_v8, 0.0  ;;  %v149_v13 = vsel %vm70_vm1, %v144_v9, 0.0 }
  0xa4   :  { %v290_v38 = vadd.f32 %v286_v3, %v203_v36  ;;  %v152_v14 = vsub.f32 %v150_v12, %v142_v46  ;;  %v158_v39 = vadd.f32 %v156_v63, %v150_v12  ;;  %v151_v58 = vsub.f32 %v149_v13, %v141_v50 }
  0xa5   :  { %v288_v17 = vadd.f32 %v284_v10, %v200_v7  ;;  %v157_v18 = vadd.f32 %v155_v0, %v149_v13  ;;  %v302_v19 = vand.u32 2147483647, %v294_v4  ;;  %v300_v23 = vand.u32 2147483647, %v292_v11 }
  0xa6   :  { %v298_v2 = vand.u32 2147483647, %v290_v38  ;;  %v219_v59 = vrot.slane %v152_v14, %v428_v6  ;;  %v275_v20 = vrot.slane %v158_v39, %v428_v6  ;;  %v215_v24 = vrot.slane %v151_v58, %v428_v6 }
  0xa7   :  { %v296_v22 = vand.u32 2147483647, %v288_v17  ;;  %v271_v7 = vrot.slane %v157_v18, %v428_v6 }
  0xa8   :  { %v306_v16 = vadd.f32 %v302_v19, %v298_v2  ;;  %v223_v33 = vsel %vm165_vm5, %v219_v59, %v211_v55  ;;  %v279_v35 = vsel %vm165_vm5, %v275_v20, %v267_v26  ;;  %v221_v28 = vsel %vm165_vm5, %v215_v24, %v210_v5 }
  0xa9   :  { %v304_v51 = vadd.f32 %v300_v23, %v296_v22  ;;  %v291_v25 = vadd.f32 %v287_v15, %v223_v33  ;;  %v295_v27 = vsub.f32 %v495_v21, %v279_v35  ;;  %v277_v6 = vsel %vm165_vm5, %v271_v7, %v480_v60 }
  0xaa   :  { %v289_v29 = vadd.f32 %v285_v48, %v221_v28  ;;  %311 = vst.msk [vmem:[#allocation5 + $0x10] sm:$0xff] %vm308_vm6, %v306_v16  ;;  %v293_v26 = vsub.f32 %v473_v57, %v277_v6 }
  0xab   :  { %v299_v30 = vand.u32 2147483647, %v291_v25  ;;  %v303_v31 = vand.u32 2147483647, %v295_v27  ;;  %309 = vst.msk [vmem:[#allocation5] sm:$0xff] %vm308_vm6, %v304_v51 }
  0xac   :  { %v297_v56 = vand.u32 2147483647, %v289_v29  ;;  %v301_v21 = vand.u32 2147483647, %v293_v26 }
  0xad   :  { %v307_v1 = vadd.f32 %v303_v31, %v299_v30 }
  0xae   :  { %v305_v34 = vadd.f32 %v301_v21, %v297_v56 }
  0xaf   :  { %312 = vst.msk [vmem:[#allocation5 + $0x18] sm:$0xff] %vm308_vm6, %v307_v1 }
  0xb0   :  { %310 = vst.msk [vmem:[#allocation5 + $0x8] sm:$0xff] %vm308_vm6, %v305_v34 }
  0xb1   :  { %369 = shalt.err (!%p366_p12)
}
  0xb2   :  { %s370_s11 = scalar_lea.hbm %s571_s3, 512 }
  0xb3   :  { %p371_p13 = scmp.ne.s32.totalorder %s571_s3, %s370_s11  ;;  %p374_p0 = scmp.lt.u32.totalorder %s370_s11, %s571_s3 }
  0xb5   :  { %p376_p1 = pnand %p374_p0, %p371_p13 }
  0xb7   :  { %379 = shalt.err (!%p376_p1)
}
  0xb8   :  { %324 = dma.vmem_to_hbm [thread:$0]  %s319_s2, 512, %s571_s3, [#allocation4], %s385_s22, %s385_s22, %s386_s23  }
  0xb9   :  { %382 = dma.done.wait [#allocation4], 512  }
  0xba   :  { %383 = vsyncadd [#allocation4], 4294966784 }
  0xbb   :  { %328 = vsyncpa [#allocation3], 1 }
  0xbc   :  { %329 = vsyncpa [#allocation4], 1 }

</bundles_post_ra>
